<compile_context>
chip_gen: v5e
topology: v5e:2x2
jax: 0.10.0
libtpu: 0.0.40
codegen_flags: <defaults>
</compile_context>

<pallas_src>
import functools

import jax
import jax.numpy as jnp
from jax.experimental import pallas as pl
from jax.experimental.pallas import tpu as pltpu

HIDDEN = 32            # hidden width fixed by the module
IN_PAD = 32            # input features zero-padded up to this (input_dim <= 32)
OUT_PAD = 8            # output head zero-padded to 8 sublanes (output_dim <= 8)
LANE = 128             # each sub-chain processes one 128-lane batch slice
SLAB_ROWS = 5 * HIDDEN  # 4 weight blocks + 1 bias block


def dqn_kernel(x_ref, p_ref, o_ref, *, n_sub, fold_b1):
    """One batch tile: [IN_PAD, n_sub*128] activations -> [OUT_PAD, n_sub*128] Q-values."""
    mm_dtype = x_ref.dtype   # matmul operand dtype (f32 or bf16, pre-cast host-side)
    sub = LANE

    # Weight views into the VMEM-resident parameter slab.  All ref-slice
    # offsets/sizes are multiples of 32 sublanes -> aligned for f32 and bf16.
    w1 = p_ref[0 * HIDDEN:1 * HIDDEN, :]                    # [32, 32] (b1 folded in col in_dim)
    w2 = p_ref[1 * HIDDEN:2 * HIDDEN, :]                    # [32, 32]
    w3 = p_ref[2 * HIDDEN:3 * HIDDEN, :]                    # [32, 32]
    w4 = p_ref[3 * HIDDEN:4 * HIDDEN, :][:OUT_PAD, :]       # [ 8, 32] (value-level slice)

    # Bias block: upcast to f32 and lane-broadcast ONCE per grid step
    # (hoisted out of the sub-chain loop).
    bias = p_ref[4 * HIDDEN:5 * HIDDEN, :].astype(jnp.float32)   # [32, 32], cols 0..3 used
    b2 = jnp.broadcast_to(bias[:, 0:1], (HIDDEN, sub))
    b3 = jnp.broadcast_to(bias[:, 1:2], (HIDDEN, sub))
    b4 = jnp.broadcast_to(bias[:OUT_PAD, 2:3], (OUT_PAD, sub))
    b1 = None if fold_b1 else jnp.broadcast_to(bias[:, 3:4], (HIDDEN, sub))

    # Independent 128-lane sub-chains (static unroll) so the tiny dependent
    # matmul chains interleave on the MXU and hide result-FIFO latency.
    for j in range(n_sub):
        xs = x_ref[:, j * sub:(j + 1) * sub]                               # [32, 128]
        h = jnp.dot(w1, xs, preferred_element_type=jnp.float32)            # bias via ones-row
        if not fold_b1:
            h = h + b1
        h = jnp.tanh(h)
        h = jnp.dot(w2, h.astype(mm_dtype), preferred_element_type=jnp.float32) + b2
        h = jnp.maximum(h, 0.0)
        h = jnp.dot(w3, h.astype(mm_dtype), preferred_element_type=jnp.float32) + b3
        h = jnp.maximum(h, 0.0)
        out = jnp.dot(w4, h.astype(mm_dtype), preferred_element_type=jnp.float32) + b4
        o_ref[:, j * sub:(j + 1) * sub] = out.astype(o_ref.dtype)


def pack_params(params, matmul_dtype=jnp.float32):
    """Pack 4 torch-layout layers (w:[out,in], b:[out]) into ONE padded slab.

    Slab layout ([5*32, 32], stored in matmul_dtype):
      rows   0.. 31 : w1 (zero-padded input cols; b1 folded into column in_dim
                      when input_dim < 32 — the matching x row is set to 1.0)
      rows  32.. 63 : w2
      rows  64.. 95 : w3
      rows  96..127 : w4 (zero-padded to 32 output rows)
      rows 128..159 : biases as columns: col0=b2, col1=b3, col2=b4,
                      col3=b1 (only if it could not be folded)
    """
    (w1, b1), (w2, b2), (w3, b3), (w4, b4) = params
    in_dim = w1.shape[1]
    out_dim = w4.shape[0]
    assert in_dim <= IN_PAD, "input_dim > 32 not supported by this packing"
    assert out_dim <= OUT_PAD, "output_dim > 8 not supported by this packing"
    fold_b1 = in_dim < IN_PAD

    w1p = jnp.zeros((HIDDEN, HIDDEN), jnp.float32).at[:, :in_dim].set(w1)
    if fold_b1:
        w1p = w1p.at[:, in_dim].set(b1)   # ones-row in x_t supplies the bias

    slab = jnp.zeros((SLAB_ROWS, HIDDEN), jnp.float32)
    slab = slab.at[0 * HIDDEN:1 * HIDDEN, :].set(w1p)
    slab = slab.at[1 * HIDDEN:2 * HIDDEN, :].set(w2)
    slab = slab.at[2 * HIDDEN:3 * HIDDEN, :].set(w3)
    slab = slab.at[3 * HIDDEN:3 * HIDDEN + out_dim, :].set(w4)
    slab = slab.at[4 * HIDDEN:5 * HIDDEN, 0].set(b2)
    slab = slab.at[4 * HIDDEN:5 * HIDDEN, 1].set(b3)
    slab = slab.at[4 * HIDDEN:4 * HIDDEN + out_dim, 2].set(b4)
    if not fold_b1:
        slab = slab.at[4 * HIDDEN:5 * HIDDEN, 3].set(b1)
    return slab.astype(matmul_dtype), in_dim, out_dim, fold_b1


def _default_tile_b(batch):
    """128-lane sub-chains, up to 4 per tile; keep >= 2 grid steps once B > 128
    so v7x's two TensorCores both get work, while using 512-lane tiles for big
    replay batches on single-TC v5e/v6e (fewer ~0.35us grid-step overheads)."""
    if batch <= LANE:
        return LANE
    return min(4, pl.cdiv(batch, 2 * LANE)) * LANE


def _dqn_apply(slab, x, *, in_dim, out_dim, fold_b1, matmul_dtype, tile_b):
    batch = x.shape[0]
    tb = _default_tile_b(batch) if tile_b is None else tile_b
    assert tb % LANE == 0
    n_sub = tb // LANE
    n_tiles = pl.cdiv(batch, tb)
    b_pad = n_tiles * tb

    # Transposed, zero-padded, pre-cast activations: batch on the lane axis.
    # Fused into the same jit as the kernel call + output back-transpose.
    x_t = jnp.zeros((IN_PAD, b_pad), matmul_dtype)
    x_t = x_t.at[:in_dim, :batch].set(x.T.astype(matmul_dtype))
    if fold_b1:
        x_t = x_t.at[in_dim, :].set(1.0)   # ones-row feeding the folded b1 column

    kernel = functools.partial(dqn_kernel, n_sub=n_sub, fold_b1=fold_b1)
    out_t = pl.pallas_call(
        kernel,
        out_shape=jax.ShapeDtypeStruct((OUT_PAD, b_pad), jnp.float32),
        grid=(n_tiles,),
        in_specs=[
            pl.BlockSpec((IN_PAD, tb), lambda i: (0, i)),          # x tile (pipelined)
            pl.BlockSpec((SLAB_ROWS, HIDDEN), lambda i: (0, 0)),   # params, VMEM-resident
        ],
        out_specs=pl.BlockSpec((OUT_PAD, tb), lambda i: (0, i)),
        compiler_params=pltpu.CompilerParams(
            dimension_semantics=("parallel",)),   # batch tiles across v7x's 2 TCs
    )(x_t, slab)

    return out_t[:out_dim, :batch].T   # [batch, output_dim]


def make_dqn_forward(params, *, matmul_dtype=jnp.float32, tile_b=None):
    """Pack params once (hoisted), return a jitted forward(x) -> [B, output_dim]."""
    slab, in_dim, out_dim, fold_b1 = pack_params(params, matmul_dtype)
    fn = jax.jit(functools.partial(
        _dqn_apply, in_dim=in_dim, out_dim=out_dim, fold_b1=fold_b1,
        matmul_dtype=matmul_dtype, tile_b=tile_b))
    return functools.partial(fn, slab)


def init_linear(key, fan_in, fan_out):
    """Deterministic init mimicking nn.Linear defaults; torch layout w:[out,in], b:[out]."""
    kw, kb = jax.random.split(key)
    bound = 1.0 / jnp.sqrt(jnp.float32(fan_in))
    w = jax.random.uniform(kw, (fan_out, fan_in), jnp.float32, -bound, bound)
    b = jax.random.uniform(kb, (fan_out,), jnp.float32, -bound, bound)
    return w, b


def reference_forward(x, params):
    (w1, b1), (w2, b2), (w3, b3), (w4, b4) = params
    h = jnp.tanh(x @ w1.T + b1)
    h = jnp.maximum(h @ w2.T + b2, 0.0)
    h = jnp.maximum(h @ w3.T + b3, 0.0)
    return h @ w4.T + b4


if __name__ == "__main__":
    # FrozenLake-like sizes: 16 one-hot states, 4 actions; replay-sized batch
    # (non-multiple of the tile -> exercises padding + the 2-step grid path).
    batch, input_dim, output_dim = 300, 16, 4

    key = jax.random.PRNGKey(0)
    kx, k1, k2, k3, k4 = jax.random.split(key, 5)

    x = jax.random.normal(kx, (batch, input_dim), jnp.float32)
    params = (
        init_linear(k1, input_dim, HIDDEN),
        init_linear(k2, HIDDEN, HIDDEN),
        init_linear(k3, HIDDEN, HIDDEN),
        init_linear(k4, HIDDEN, output_dim),
    )

    ref = reference_forward(x, params)

    # f32 path (numerically faithful to the PyTorch module).
    forward_f32 = make_dqn_forward(params)            # params packed once, forward jitted
    out = jax.block_until_ready(forward_f32(x))
    assert out.shape == (batch, output_dim)
    assert jnp.allclose(out, ref, atol=1e-4, rtol=1e-4), "f32 mismatch vs JAX reference"
    jax.block_until_ready(forward_f32(x))             # reuses packed params + compile cache

    # bf16 matmul operands / halved DMAs with f32 accumulation (v6e/v7x fast path).
    forward_bf16 = make_dqn_forward(params, matmul_dtype=jnp.bfloat16)
    out_bf16 = jax.block_until_ready(forward_bf16(x))
    assert jnp.allclose(out_bf16, ref, atol=1e-1, rtol=1e-1), "bf16 path drifted too far"

    print("KERNEL_OK")
</pallas_src>

<mosaic_0001>
module attributes {stable_mosaic.version = 11 : i64} {
  func.func @dqn_kernel(%arg0: i32, %arg1: memref<32x256xf32, #tpu.memory_space<vmem>>, %arg2: memref<160x32xf32, #tpu.memory_space<vmem>>, %arg3: memref<8x256xf32, #tpu.memory_space<vmem>>) attributes {dimension_semantics = [#tpu.dimension_semantics<parallel>], iteration_bounds = array<i64: 2>, scalar_prefetch = 0 : i64, scratch_operands = 0 : i64, tpu.core_type = #tpu.core_type<tc>, window_params = [{transform_indices = @transform_0, window_bounds = array<i64: 32, 256>}, {pipeline_mode = #tpu.pipeline_mode<synchronous>, transform_indices = @transform_1, window_bounds = array<i64: 160, 32>}, {transform_indices = @transform_2, window_bounds = array<i64: 8, 256>}]} {
    %c0 = arith.constant 0 : index
    %c0_0 = arith.constant 0 : index
    %0 = vector.load %arg2[%c0, %c0_0] : memref<160x32xf32, #tpu.memory_space<vmem>>, vector<32x32xf32>
    %c32 = arith.constant 32 : index
    %c0_1 = arith.constant 0 : index
    %1 = vector.load %arg2[%c32, %c0_1] : memref<160x32xf32, #tpu.memory_space<vmem>>, vector<32x32xf32>
    %c64 = arith.constant 64 : index
    %c0_2 = arith.constant 0 : index
    %2 = vector.load %arg2[%c64, %c0_2] : memref<160x32xf32, #tpu.memory_space<vmem>>, vector<32x32xf32>
    %c96 = arith.constant 96 : index
    %c0_3 = arith.constant 0 : index
    %3 = vector.load %arg2[%c96, %c0_3] : memref<160x32xf32, #tpu.memory_space<vmem>>, vector<32x32xf32>
    %4 = vector.extract_strided_slice %3 {offsets = [0, 0], sizes = [8, 32], strides = [1, 1]} : vector<32x32xf32> to vector<8x32xf32>
    %c128 = arith.constant 128 : index
    %c0_4 = arith.constant 0 : index
    %5 = vector.load %arg2[%c128, %c0_4] : memref<160x32xf32, #tpu.memory_space<vmem>>, vector<32x32xf32>
    %6 = vector.extract_strided_slice %5 {offsets = [0, 0], sizes = [32, 1], strides = [1, 1]} : vector<32x32xf32> to vector<32x1xf32>
    %7 = vector.shape_cast %6 : vector<32x1xf32> to vector<32x1xf32>
    %8 = vector.broadcast %7 : vector<32x1xf32> to vector<32x128xf32>
    %9 = vector.extract_strided_slice %5 {offsets = [0, 1], sizes = [32, 1], strides = [1, 1]} : vector<32x32xf32> to vector<32x1xf32>
    %10 = vector.shape_cast %9 : vector<32x1xf32> to vector<32x1xf32>
    %11 = vector.broadcast %10 : vector<32x1xf32> to vector<32x128xf32>
    %12 = vector.extract_strided_slice %5 {offsets = [0, 2], sizes = [8, 1], strides = [1, 1]} : vector<32x32xf32> to vector<8x1xf32>
    %13 = vector.shape_cast %12 : vector<8x1xf32> to vector<8x1xf32>
    %14 = vector.broadcast %13 : vector<8x1xf32> to vector<8x128xf32>
    %c0_5 = arith.constant 0 : index
    %c0_6 = arith.constant 0 : index
    %15 = vector.load %arg1[%c0_5, %c0_6] : memref<32x256xf32, #tpu.memory_space<vmem>>, vector<32x128xf32>
    %cst = arith.constant dense<0.000000e+00> : vector<32x128xf32>
    %16 = tpu.matmul %0, %15, %cst {dimension_numbers = #tpu.dot_dimension_numbers<[1], [0], [0], [1], [0, 0, 1, 1], [], []>} : vector<32x32xf32>, vector<32x128xf32>, vector<32x128xf32> -> vector<32x128xf32>
    %17 = math.tanh %16 : vector<32x128xf32>
    %cst_7 = arith.constant dense<0.000000e+00> : vector<32x128xf32>
    %18 = tpu.matmul %1, %17, %cst_7 {dimension_numbers = #tpu.dot_dimension_numbers<[1], [0], [0], [1], [0, 0, 1, 1], [], []>} : vector<32x32xf32>, vector<32x128xf32>, vector<32x128xf32> -> vector<32x128xf32>
    %19 = arith.addf %18, %8 : vector<32x128xf32>
    %cst_8 = arith.constant 0.000000e+00 : f32
    %20 = vector.broadcast %cst_8 : f32 to vector<32x128xf32>
    %21 = arith.maximumf %19, %20 : vector<32x128xf32>
    %cst_9 = arith.constant dense<0.000000e+00> : vector<32x128xf32>
    %22 = tpu.matmul %2, %21, %cst_9 {dimension_numbers = #tpu.dot_dimension_numbers<[1], [0], [0], [1], [0, 0, 1, 1], [], []>} : vector<32x32xf32>, vector<32x128xf32>, vector<32x128xf32> -> vector<32x128xf32>
    %23 = arith.addf %22, %11 : vector<32x128xf32>
    %cst_10 = arith.constant 0.000000e+00 : f32
    %24 = vector.broadcast %cst_10 : f32 to vector<32x128xf32>
    %25 = arith.maximumf %23, %24 : vector<32x128xf32>
    %cst_11 = arith.constant dense<0.000000e+00> : vector<8x128xf32>
    %26 = tpu.matmul %4, %25, %cst_11 {dimension_numbers = #tpu.dot_dimension_numbers<[1], [0], [0], [1], [0, 0, 1, 1], [], []>} : vector<8x32xf32>, vector<32x128xf32>, vector<8x128xf32> -> vector<8x128xf32>
    %27 = arith.addf %26, %14 : vector<8x128xf32>
    %c0_12 = arith.constant 0 : index
    %c0_13 = arith.constant 0 : index
    %28 = vector.load %arg3[%c0_12, %c0_13] : memref<8x256xf32, #tpu.memory_space<vmem>>, vector<8x128xf32>
    tpu.vector_store %arg3[%c0_12, %c0_13], %27 {strides = array<i32>} : memref<8x256xf32, #tpu.memory_space<vmem>>, vector<8x128xf32>,
    %c0_14 = arith.constant 0 : index
    %c128_15 = arith.constant 128 : index
    %29 = vector.load %arg1[%c0_14, %c128_15] : memref<32x256xf32, #tpu.memory_space<vmem>>, vector<32x128xf32>
    %cst_16 = arith.constant dense<0.000000e+00> : vector<32x128xf32>
    %30 = tpu.matmul %0, %29, %cst_16 {dimension_numbers = #tpu.dot_dimension_numbers<[1], [0], [0], [1], [0, 0, 1, 1], [], []>} : vector<32x32xf32>, vector<32x128xf32>, vector<32x128xf32> -> vector<32x128xf32>
    %31 = math.tanh %30 : vector<32x128xf32>
    %cst_17 = arith.constant dense<0.000000e+00> : vector<32x128xf32>
    %32 = tpu.matmul %1, %31, %cst_17 {dimension_numbers = #tpu.dot_dimension_numbers<[1], [0], [0], [1], [0, 0, 1, 1], [], []>} : vector<32x32xf32>, vector<32x128xf32>, vector<32x128xf32> -> vector<32x128xf32>
    %33 = arith.addf %32, %8 : vector<32x128xf32>
    %cst_18 = arith.constant 0.000000e+00 : f32
    %34 = vector.broadcast %cst_18 : f32 to vector<32x128xf32>
    %35 = arith.maximumf %33, %34 : vector<32x128xf32>
    %cst_19 = arith.constant dense<0.000000e+00> : vector<32x128xf32>
    %36 = tpu.matmul %2, %35, %cst_19 {dimension_numbers = #tpu.dot_dimension_numbers<[1], [0], [0], [1], [0, 0, 1, 1], [], []>} : vector<32x32xf32>, vector<32x128xf32>, vector<32x128xf32> -> vector<32x128xf32>
    %37 = arith.addf %36, %11 : vector<32x128xf32>
    %cst_20 = arith.constant 0.000000e+00 : f32
    %38 = vector.broadcast %cst_20 : f32 to vector<32x128xf32>
    %39 = arith.maximumf %37, %38 : vector<32x128xf32>
    %cst_21 = arith.constant dense<0.000000e+00> : vector<8x128xf32>
    %40 = tpu.matmul %4, %39, %cst_21 {dimension_numbers = #tpu.dot_dimension_numbers<[1], [0], [0], [1], [0, 0, 1, 1], [], []>} : vector<8x32xf32>, vector<32x128xf32>, vector<8x128xf32> -> vector<8x128xf32>
    %41 = arith.addf %40, %14 : vector<8x128xf32>
    %c0_22 = arith.constant 0 : index
    %c128_23 = arith.constant 128 : index
    %42 = vector.load %arg3[%c0_22, %c128_23] : memref<8x256xf32, #tpu.memory_space<vmem>>, vector<8x128xf32>
    tpu.vector_store %arg3[%c0_22, %c128_23], %41 {strides = array<i32>} : memref<8x256xf32, #tpu.memory_space<vmem>>, vector<8x128xf32>,
    return
  }
  func.func @transform_0(%arg0: i32) -> (i32, i32) {
    %c0_i32 = arith.constant 0 : i32
    %c0_i32_0 = arith.constant 0 : i32
    return %c0_i32, %arg0 : i32, i32
  }
  func.func @transform_1(%arg0: i32) -> (i32, i32) {
    %c0_i32 = arith.constant 0 : i32
    %c0_i32_0 = arith.constant 0 : i32
    %c0_i32_1 = arith.constant 0 : i32
    return %c0_i32, %c0_i32_0 : i32, i32
  }
  func.func @transform_2(%arg0: i32) -> (i32, i32) {
    %c0_i32 = arith.constant 0 : i32
    %c0_i32_0 = arith.constant 0 : i32
    return %c0_i32, %arg0 : i32, i32
  }
}

</mosaic_0001>

<bundles_post_ra>
// kernel: _dqn_apply.1
= control target key start
LH: loop header
LB: loop body
LE: loop exit
PB: predicated region body
PF: predicated region fallthrough
CT: control target
= control target key end

     0   :  { %s727_s9 = smov 0   ;;  %s729_s10 = smov 0   ;;  %s963_s0 = inlined_call_operand.vmem [shape: f32[32,512], index: 0, kind: input, shape index: {}]   ;;  %s964_s1 = inlined_call_operand.vmem [shape: f32[160,32], index: 1, kind: input, shape index: {}]   ;;  %s965_s2 = inlined_call_operand.vmem [shape: f32[8,512], index: 2, kind: output, shape index: {}]  }
   0x1   :  { %s731_s11 = smov 0  }
   0x2 LB: > { %s587_s12 = sadd.s32 4294967295, %s707_s11   ;;  %s744_s13 = sadd.s32 1, %s707_s11   ;;  %s707_s11 = sphi %s731_s11, %s968_s11   ;;  %s703_s10 = sphi %s729_s10, %s967_s10   ;;  %s699_s9 = sphi %s727_s9, %s966_s9  }
   0x3   : > { %s16_s14 = ssub.s32 %s707_s11, %s744_s13  ;;  %s19_s15 = sadd.s32 1, %s703_s10 }
   0x4   : > { %p17_p0 = scmp.eq.s32.totalorder %s16_s14, 0  ;;  %p26_p1 = scmp.ne.s32.totalorder %s703_s10, %s699_s9 }
   0x5   : > { %p27_p2 = scmp.eq.s32.totalorder %s707_s11, 0  ;;  %p590_p4 = scmp.ge.s32.totalorder %s707_s11, 2 }
   0x6   : > { %s753_s16 = scalar_select %p17_p0, %s703_s10, %s19_s15  }
   0x7   : > { %p28_p3 = por %p27_p2, %p26_p1  ;;  %102 = sbr.rel (%p590_p4) target bundleno = 24 (0x18), region = 20 }
   0xc   : > { %105 = sbr.rel (!%p28_p3) target bundleno = 24 (0x18), region = 24  ;;  %s107_s17 = sand.u32 (%p28_p3), 1, %s703_s10  }
   0xd   : > { %s626_s18 = sshll.u32 (%p28_p3), %s707_s11, 4  ;;  %s591_s19 = sshll.u32 (%p28_p3), %s107_s17, 6 }
   0xe   : > { %s112_s22 = scalar_lea.vmem (%p28_p3), %s963_s0, %s626_s18  ;;  %s109_s23 = scalar_lea.vmem (%p28_p3), [#allocation2], %s591_s19 }
   0xf   : > { %v125_v0 = vld [vmem:[%s112_s22] sm:$0xff] (%p28_p3)  ;;  %v127_v1 = vld [vmem:[%s112_s22 + $0x8] sm:$0xff] (%p28_p3) }
  0x10   : > { %v129_v2 = vld [vmem:[%s112_s22 + $0x20] sm:$0xff] (%p28_p3)  ;;  %126 = vst [vmem:[%s109_s23] sm:$0xff] (%p28_p3), %v125_v0  ;;  %v131_v3 = vld [vmem:[%s112_s22 + $0x28] sm:$0xff] (%p28_p3) }
  0x11   : > { %128 = vst [vmem:[%s109_s23 + $0x8] sm:$0xff] %v127_v1  ;;  %v133_v4 = vld [vmem:[%s112_s22 + $0x40] sm:$0xff]  ;;  %v135_v5 = vld [vmem:[%s112_s22 + $0x48] sm:$0xff] }
  0x12   : > { %130 = vst [vmem:[%s109_s23 + $0x10] sm:$0xff] %v129_v2  ;;  %v137_v6 = vld [vmem:[%s112_s22 + $0x60] sm:$0xff]  ;;  %v139_v7 = vld [vmem:[%s112_s22 + $0x68] sm:$0xff] }
  0x13   : > { %132 = vst [vmem:[%s109_s23 + $0x18] sm:$0xff] %v131_v3 }
  0x14   : > { %134 = vst [vmem:[%s109_s23 + $0x20] sm:$0xff] %v133_v4 }
  0x15   : > { %136 = vst [vmem:[%s109_s23 + $0x28] sm:$0xff] %v135_v5 }
  0x16   : > { %138 = vst [vmem:[%s109_s23 + $0x30] sm:$0xff] %v137_v6 }
  0x17   : > { %140 = vst [vmem:[%s109_s23 + $0x38] sm:$0xff] %v139_v7 }
  0x18 PF: > { %p594_p5 = scmp.ge.s32.totalorder %s707_s11, 1  ;;  %p145_p6 = scmp.lt.s32.totalorder %s707_s11, 3 }
  0x1a   : > { %p146_p7 = pnand %p594_p5, %p145_p6 }
  0x1b   : > { %s152_s24 = sand.u32 (!%p146_p7), 1, %s699_s9   ;;  %s596_s15 = sshll.u32 (!%p146_p7), %s587_s12, 1 }
  0x1c   : > { %149 = sbr.rel (%p146_p7) target bundleno = 1148 (0x47c), region = 47  ;;  %s595_s25 = sshll.u32 (!%p146_p7), %s152_s24, 6 }
  0x1d   : > { %s764_s26 = scalar_lea.vmem (!%p146_p7), [#allocation2], %s595_s25  ;;  %p175_p8 = scmp.lt.s32.totalorder (!%p146_p7), %s596_s15, 3 }
  0x21   : > { %v240_v8 = vld [vmem:[%s764_s26 + $0x30] sm:$0xff]  ;;  %v239_v9 = vld [vmem:[%s764_s26 + $0x20] sm:$0xff]  ;;  %vm241_vm0 = vcmask 261120   ;;  %v778_v13 = vld [vmem:[%s964_s1 + $0x18] sm:$0xff]  ;;  %v709_v17 = vmov 0   ;;  %v710_v34 = vmov 1  }
  0x22   : > { %266 = vmatpush.msra.mxu0 %v240_v8  ;;  %627 = vmatpush.msra.mxu2 %v240_v8  ;;  %v238_v10 = vld [vmem:[%s764_s26 + $0x10] sm:$0xff]  ;;  %v237_v11 = vld [vmem:[%s764_s26] sm:$0xff]  ;;  %v787_v14 = vld [vmem:[%s964_s1 + $0x8] sm:$0xff]  ;;  %s970_s15 = smov (!%p175_p8, %s596_s15), 3 }
  0x23   : > { %v773_v12 = vld [vmem:[%s964_s1] sm:$0xff]  ;;  %v794_v15 = vld [vmem:[%s964_s1 + $0x10] sm:$0xff]  ;;  %v194_v16 = vld [vmem:[%s964_s1 + $0x88] sm:$0xff]  ;;  %663 = vset.pattern.permute.xlu1 %v709_v17  ;;  %662 = vset.pattern.permute.xlu0 %v709_v17  ;;  %s597_s17 = sshll.u32 %s970_s15, 3 }
  0x24   : > { %267 = vmatpush.msra.mxu0 %v239_v9  ;;  %628 = vmatpush.msra.mxu2 %v239_v9  ;;  %v196_v19 = vld [vmem:[%s964_s1 + $0x98] sm:$0xff]  ;;  %v807_v20 = vld [vmem:[%s964_s1 + $0x80] sm:$0xff]  ;;  %v195_v24 = vld [vmem:[%s964_s1 + $0x90] sm:$0xff]  ;;  %v711_v9 = vmov 2   ;;  %s921_s19 = scalar_lea.vmem %s965_s2, %s597_s17 }
  0x25   : > { %204 = vperm.xlu1 %663, %v194_v16   ;;  %214 = vperm.xlu0 %662, %v196_v19   ;;  %v816_v28 = vld [vmem:[%s964_s1 + $0x20] sm:$0xff]  ;;  %v821_v29 = vld [vmem:[%s964_s1 + $0x38] sm:$0xff]  ;;  %v830_v31 = vld [vmem:[%s964_s1 + $0x28] sm:$0xff] }
  0x26   : > { %268 = vmatpush.msra.mxu0 %v238_v10  ;;  %629 = vmatpush.msra.mxu2 %v238_v10  ;;  %v837_v32 = vld [vmem:[%s964_s1 + $0x30] sm:$0xff]  ;;  %v857_v50 = vld [vmem:[%s964_s1 + $0x40] sm:$0xff]  ;;  %v864_v51 = vld [vmem:[%s964_s1 + $0x48] sm:$0xff] }
  0x27   : > { %664 = vset.pattern.permute.xlu2 %v710_v34  ;;  %v871_v52 = vld [vmem:[%s964_s1 + $0x50] sm:$0xff]  ;;  %v878_v53 = vld [vmem:[%s964_s1 + $0x58] sm:$0xff]  ;;  %v897_v6 = vld [vmem:[%s964_s1 + $0x60] sm:$0xff] }
  0x28   : > { %269 = vmatpush.msra.mxu0 %v237_v11  ;;  %630 = vmatpush.msra.mxu2 %v237_v11  ;;  %v404_v7 = vld [vmem:[%s764_s26 + $0x38] sm:$0xff]  ;;  %v403_v8 = vld [vmem:[%s764_s26 + $0x28] sm:$0xff] }
  0x29   : > { %598 = vmatmul.msk.f32.vlgmr.msra.gmra.mxu0 %vm241_vm0, %v773_v12  ;;  %601 = vmatmul.msk.f32.vlgmr.msra.gmra.mxu2 %vm241_vm0, %v778_v13  ;;  %v402_v10 = vld [vmem:[%s764_s26 + $0x18] sm:$0xff]  ;;  %v401_v11 = vld [vmem:[%s764_s26 + $0x8] sm:$0xff] }
  0x2a   : > { %230 = vperm.xlu2 %664, %v196_v19  }
  0x2d   : > { %199 = vperm.xlu1 %663, %v807_v20   ;;  %209 = vperm.xlu0 %662, %v195_v24  }
  0x31   : > { %599 = vmatmul.msk.f32.gmra.mxu0 %vm241_vm0, %v787_v14 }
  0x32   : > { %226 = vperm.xlu2 %664, %v195_v24  }
  0x35   : > { %666 = vset.pattern.permute.xlu1 %v710_v34  ;;  %665 = vset.pattern.permute.xlu0 %v710_v34 }
  0x36   : > { %218 = vperm.xlu1 %666, %v807_v20   ;;  %222 = vperm.xlu0 %665, %v194_v16  }
  0x39   : > { %600 = vmatmul.msk.f32.gmra.mxu0 %vm241_vm0, %v794_v15 }
  0x3a   : > { %667 = vset.pattern.permute.xlu2 %v711_v9 }
  0x3b   : > { %234 = vperm.xlu2 %667, %v807_v20  }
  0x3e   : > { %668 = vset.pattern.permute.xlu0 %v711_v9 }
  0x84   : > { %v882_v56 = vpop.permute.xlu2 %230 }
  0x8c   : > { %v884_v58 = vpop.permute.xlu2 %226 }
  0x95   : > { %v916_v16 = vpop.permute.xlu2 %234 }
  0x97   : > { %v842_v35 = vpop.permute.xlu1 %204  ;;  %v844_v36 = vpop.permute.xlu0 %214 }
  0x9f   : > { %v847_v41 = vpop.permute.xlu1 %199  ;;  %v849_v42 = vpop.permute.xlu0 %209 }
  0xa6   : > { %v271_v18 = vpop.f32.mrf.mxu0 }
  0xa8   : > { %v886_v59 = vpop.permute.xlu0 %222  ;;  %v890_v63 = vpop.permute.xlu1 %218 }
  0xac   : > { %v280_v21 = vpop.f32.mrf.mxu2 }
  0xad   : > { %669 = vtanh.f32 %v280_v21 }
  0xae   : > { %v274_v22 = vpop.f32.mrf.mxu0 }
  0xb3   : > { %v670_v23 = vpop.eup %669 }
  0xb4   : > { %311 = vmatpush.msra.mxu1 %v670_v23  ;;  %631 = vmatpush.msra.mxu3 %v670_v23 }
  0xb6   : > { %v277_v25 = vpop.f32.mrf.mxu0 }
  0xb7   : > { %671 = vtanh.f32 %v277_v25 }
  0xb8   : > { %673 = vtanh.f32 %v274_v22 }
  0xb9   : > { %675 = vtanh.f32 %v271_v18 }
  0xbd   : > { %v672_v26 = vpop.eup %671 }
  0xbe   : > { %312 = vmatpush.msra.mxu1 %v672_v26  ;;  %632 = vmatpush.msra.mxu3 %v672_v26  ;;  %v674_v27 = vpop.eup %673 }
  0xbf   : > { %v676_v30 = vpop.eup %675 }
  0xc0   : > { %313 = vmatpush.msra.mxu1 %v674_v27  ;;  %633 = vmatpush.msra.mxu3 %v674_v27 }
  0xc2   : > { %314 = vmatpush.msra.mxu1 %v676_v30  ;;  %634 = vmatpush.msra.mxu3 %v676_v30 }
  0xc3   : > { %602 = vmatmul.msk.f32.vlgmr.msra.gmra.mxu1 %vm241_vm0, %v816_v28  ;;  %605 = vmatmul.msk.f32.vlgmr.msra.gmra.mxu3 %vm241_vm0, %v821_v29 }
  0xcb   : > { %603 = vmatmul.msk.f32.gmra.mxu1 %vm241_vm0, %v830_v31 }
  0xd3   : > { %604 = vmatmul.msk.f32.gmra.mxu1 %vm241_vm0, %v837_v32 }
 0x140   : > { %v316_v33 = vpop.f32.mrf.mxu1 }
 0x141   : > { %v317_v46 = vadd.f32 %v316_v33, %v847_v41 }
 0x143   : > { %v328_v49 = vmax.f32 %v317_v46, 0.0 }
 0x146   : > { %v325_v37 = vpop.f32.mrf.mxu3 }
 0x147   : > { %v326_v38 = vadd.f32 %v325_v37, %v844_v36 }
 0x148   : > { %v319_v39 = vpop.f32.mrf.mxu1 }
 0x149   : > { %v331_v40 = vmax.f32 %v326_v38, 0.0  ;;  %v320_v44 = vadd.f32 %v319_v39, %v842_v35 }
 0x14b   : > { %356 = vmatpush.msrb.mxu2 %v331_v40  ;;  %v329_v48 = vmax.f32 %v320_v44, 0.0 }
 0x150   : > { %v322_v43 = vpop.f32.mrf.mxu1 }
 0x151   : > { %v323_v45 = vadd.f32 %v322_v43, %v849_v42 }
 0x153   : > { %v330_v47 = vmax.f32 %v323_v45, 0.0 }
 0x155   : > { %357 = vmatpush.msrb.mxu2 %v330_v47 }
 0x157   : > { %358 = vmatpush.msrb.mxu2 %v329_v48 }
 0x159   : > { %359 = vmatpush.msrb.mxu2 %v328_v49 }
 0x15a   : > { %606 = vmatmul.msk.f32.vlgmr.msrb.gmra.mxu2 %vm241_vm0, %v857_v50 }
 0x162   : > { %607 = vmatmul.msk.f32.gmra.mxu2 %vm241_vm0, %v864_v51 }
 0x16a   : > { %608 = vmatmul.msk.f32.gmra.mxu2 %vm241_vm0, %v871_v52 }
 0x172   : > { %609 = vmatmul.msk.f32.gmra.mxu2 %vm241_vm0, %v878_v53 }
 0x1dd   : > { %v361_v54 = vpop.f32.mrf.mxu2 }
 0x1de   : > { %v362_v2 = vadd.f32 %v361_v54, %v890_v63 }
 0x1e0   : > { %v373_v5 = vmax.f32 %v362_v2, 0.0 }
 0x1e5   : > { %v364_v55 = vpop.f32.mrf.mxu2 }
 0x1e6   : > { %v365_v0 = vadd.f32 %v364_v55, %v886_v59 }
 0x1e8   : > { %v374_v4 = vmax.f32 %v365_v0, 0.0 }
 0x1ed   : > { %v367_v57 = vpop.f32.mrf.mxu2 }
 0x1ee   : > { %v368_v61 = vadd.f32 %v367_v57, %v884_v58 }
 0x1f0   : > { %v375_v3 = vmax.f32 %v368_v61, 0.0 }
 0x1f5   : > { %v370_v60 = vpop.f32.mrf.mxu2 }
 0x1f6   : > { %v371_v62 = vadd.f32 %v370_v60, %v882_v56 }
 0x1f8   : > { %v376_v1 = vmax.f32 %v371_v62, 0.0 }
 0x1fa   : > { %392 = vmatpush.msrb.mxu3 %v376_v1 }
 0x1fc   : > { %393 = vmatpush.msrb.mxu3 %v375_v3 }
 0x1fe   : > { %394 = vmatpush.msrb.mxu3 %v374_v4 }
 0x200   : > { %395 = vmatpush.msrb.mxu3 %v373_v5 }
 0x201   : > { %610 = vmatmul.msk.f32.vlgmr.msrb.gmra.mxu3 %vm241_vm0, %v897_v6 }
 0x202   : > { %417 = vmatpush.msra.mxu3 %v404_v7 }
 0x204   : > { %418 = vmatpush.msra.mxu3 %v403_v8 }
 0x206   : > { %419 = vmatpush.msra.mxu3 %v402_v10 }
 0x208   : > { %420 = vmatpush.msra.mxu3 %v401_v11 }
 0x209   : > { %611 = vmatmul.msk.f32.vlgmr.msra.gmra.mxu3 %vm241_vm0, %v773_v12 }
 0x211   : > { %612 = vmatmul.msk.f32.gmra.mxu3 %vm241_vm0, %v787_v14 }
 0x219   : > { %613 = vmatmul.msk.f32.gmra.mxu3 %vm241_vm0, %v794_v15 }
 0x221   : > { %614 = vmatmul.msk.f32.gmra.mxu3 %vm241_vm0, %v778_v13 }
 0x284   : > { %v397_v12 = vpop.f32.mrf.mxu3 }
 0x285   : > { %v398_v14 = vadd.f32 %v397_v12, %v916_v16 }
 0x287   : > { %400 = vst [vmem:[%s921_s19] sm:$0xff] %v398_v14 }
 0x28c   : > { %v422_v15 = vpop.f32.mrf.mxu3 }
 0x294   : > { %v425_v17 = vpop.f32.mrf.mxu3 }
 0x29c   : > { %v428_v13 = vpop.f32.mrf.mxu3 }
 0x2a4   : > { %v431_v18 = vpop.f32.mrf.mxu3 }
 0x2a5   : > { %677 = vtanh.f32 %v431_v18 }
 0x2a6   : > { %679 = vtanh.f32 %v428_v13 }
 0x2a7   : > { %681 = vtanh.f32 %v425_v17 }
 0x2a8   : > { %683 = vtanh.f32 %v422_v15 }
 0x2ab   : > { %v678_v19 = vpop.eup %677 }
 0x2ac   : > { %450 = vmatpush.msrb.mxu0 %v678_v19  ;;  %v680_v20 = vpop.eup %679 }
 0x2ad   : > { %v682_v21 = vpop.eup %681 }
 0x2ae   : > { %451 = vmatpush.msrb.mxu0 %v680_v20  ;;  %v684_v22 = vpop.eup %683 }
 0x2b0   : > { %452 = vmatpush.msrb.mxu0 %v682_v21 }
 0x2b2   : > { %453 = vmatpush.msrb.mxu0 %v684_v22 }
 0x2b3   : > { %615 = vmatmul.msk.f32.vlgmr.msrb.gmra.mxu0 %vm241_vm0, %v816_v28 }
 0x2bb   : > { %616 = vmatmul.msk.f32.gmra.mxu0 %vm241_vm0, %v830_v31 }
 0x2c3   : > { %617 = vmatmul.msk.f32.gmra.mxu0 %vm241_vm0, %v837_v32 }
 0x2cb   : > { %618 = vmatmul.msk.f32.gmra.mxu0 %vm241_vm0, %v821_v29 }
 0x330   : > { %v455_v23 = vpop.f32.mrf.mxu0 }
 0x331   : > { %v456_v34 = vadd.f32 %v455_v23, %v847_v41 }
 0x333   : > { %v467_v32 = vmax.f32 %v456_v34, 0.0 }
 0x338   : > { %v458_v24 = vpop.f32.mrf.mxu0 }
 0x339   : > { %v459_v33 = vadd.f32 %v458_v24, %v842_v35 }
 0x33b   : > { %v468_v37 = vmax.f32 %v459_v33, 0.0 }
 0x340   : > { %v461_v25 = vpop.f32.mrf.mxu0 }
 0x341   : > { %v462_v27 = vadd.f32 %v461_v25, %v849_v42 }
 0x343   : > { %v469_v31 = vmax.f32 %v462_v27, 0.0 }
 0x348   : > { %v464_v26 = vpop.f32.mrf.mxu0 }
 0x349   : > { %v465_v30 = vadd.f32 %v464_v26, %v844_v36 }
 0x34b   : > { %v470_v28 = vmax.f32 %v465_v30, 0.0 }
 0x34d   : > { %483 = vmatpush.msrb.mxu1 %v470_v28 }
 0x34f   : > { %484 = vmatpush.msrb.mxu1 %v469_v31 }
 0x351   : > { %485 = vmatpush.msrb.mxu1 %v468_v37 }
 0x353   : > { %486 = vmatpush.msrb.mxu1 %v467_v32 }
 0x354   : > { %619 = vmatmul.msk.f32.vlgmr.msrb.gmra.mxu1 %vm241_vm0, %v857_v50 }
 0x35c   : > { %620 = vmatmul.msk.f32.gmra.mxu1 %vm241_vm0, %v864_v51 }
 0x364   : > { %621 = vmatmul.msk.f32.gmra.mxu1 %vm241_vm0, %v871_v52 }
 0x36c   : > { %622 = vmatmul.msk.f32.gmra.mxu1 %vm241_vm0, %v878_v53 }
 0x3d1   : > { %v488_v29 = vpop.f32.mrf.mxu1 }
 0x3d2   : > { %v489_v43 = vadd.f32 %v488_v29, %v890_v63 }
 0x3d4   : > { %v500_v46 = vmax.f32 %v489_v43, 0.0 }
 0x3d9   : > { %v491_v35 = vpop.f32.mrf.mxu1 }
 0x3da   : > { %v492_v41 = vadd.f32 %v491_v35, %v886_v59 }
 0x3dc   : > { %v501_v45 = vmax.f32 %v492_v41, 0.0 }
 0x3e1   : > { %v494_v36 = vpop.f32.mrf.mxu1 }
 0x3e2   : > { %v495_v39 = vadd.f32 %v494_v36, %v884_v58 }
 0x3e4   : > { %v502_v44 = vmax.f32 %v495_v39, 0.0 }
 0x3e9   : > { %v497_v38 = vpop.f32.mrf.mxu1 }
 0x3ea   : > { %v498_v40 = vadd.f32 %v497_v38, %v882_v56 }
 0x3ec   : > { %v503_v42 = vmax.f32 %v498_v40, 0.0 }
 0x3ee   : > { %516 = vmatpush.msra.mxu2 %v503_v42 }
 0x3f0   : > { %517 = vmatpush.msra.mxu2 %v502_v44 }
 0x3f2   : > { %518 = vmatpush.msra.mxu2 %v501_v45 }
 0x3f4   : > { %519 = vmatpush.msra.mxu2 %v500_v46 }
 0x3f5   : > { %623 = vmatmul.msk.f32.vlgmr.msra.gmra.mxu2 %vm241_vm0, %v897_v6 }
 0x478   : > { %v521_v47 = vpop.f32.mrf.mxu2 }
 0x479   : > { %v522_v48 = vadd.f32 %v521_v47, %v916_v16 }
 0x47b   : > { %524 = vst [vmem:[%s921_s19 + $0x8] sm:$0xff] %v522_v48 }
 0x47c PF: > { %p9_p9 = scmp.ge.s32.totalorder %s744_s13, 4   ;;  %s966_s9 = smov %s703_s10 }
 0x47d   : > { %s967_s10 = smov %s753_s16  ;;  %s968_s11 = smov %s744_s13 }
 0x47e   :  { %11 = sbr.rel (!%p9_p9) target bundleno = 2 (0x2), region = 86 }

</bundles_post_ra>
